<compile_context>
chip_gen: v7x
topology: tpu7x:2x2x1
jax: 0.10.0
libtpu: 0.0.40
codegen_flags: <defaults>
</compile_context>

<pallas_src>
import functools

import jax
import jax.numpy as jnp
from jax.experimental import pallas as pl
from jax.experimental.pallas import tpu as pltpu

H = 128        # hidden width == lane width
F_IN = 4       # observation features (CartPole)
OUT = 2        # Q-values

# Row offsets of each section inside the packed (304, 128) bf16 parameter buffer.
W1_OFF = 0       # rows 0..3     : fc1 weight (4, 128)
B1_OFF = 8       # row 8         : fc1 bias
W2_OFF = 16      # rows 16..143  : fc2 weight (128, 128)
B2_OFF = 144     # row 144       : fc2 bias
W3_OFF = 160     # rows 160..287 : fc3 weight, zero-padded to 128 output lanes
B3_OFF = 288     # row 288       : fc3 bias, zero-padded to 128 lanes
P_ROWS = 304

_MIN_SPLIT = 256   # rows per TensorCore before a 2-step grid (v7x megacore) pays off


def _round_up(n, m):
    return ((n + m - 1) // m) * m


def dqn_kernel(x_ref, p_ref, o_ref):
    x = x_ref[...]                                       # (TM, 4) bf16

    # fc1 + ReLU (explicit bias add; K=4 contraction is padded by the compiler)
    w1 = p_ref[W1_OFF:W1_OFF + F_IN, :]                  # (4, 128) bf16
    b1 = p_ref[B1_OFF:B1_OFF + 1, :].astype(jnp.float32)
    h1 = jnp.maximum(jnp.dot(x, w1, preferred_element_type=jnp.float32) + b1, 0.0)

    # fc2 + ReLU
    w2 = p_ref[W2_OFF:W2_OFF + H, :]                     # (128, 128) bf16
    b2 = p_ref[B2_OFF:B2_OFF + 1, :].astype(jnp.float32)
    h2 = jnp.maximum(
        jnp.dot(h1.astype(jnp.bfloat16), w2, preferred_element_type=jnp.float32) + b2,
        0.0,
    )

    # fc3 (Q-values).  Weight is lane-padded to 128 for the MXU; only the first OUT
    # columns are stored -> 8 B/row of HBM writeback instead of 512 B/row.
    w3 = p_ref[W3_OFF:W3_OFF + H, :]                     # (128, 128) bf16, cols >= OUT are 0
    b3 = p_ref[B3_OFF:B3_OFF + 1, :].astype(jnp.float32)
    q = jnp.dot(h2.astype(jnp.bfloat16), w3, preferred_element_type=jnp.float32)
    o_ref[...] = (q[:, :OUT] + b3[:, :OUT]).astype(o_ref.dtype)


def pack_params(params):
    """Pack (w1,b1,w2,b2,w3,b3) into one lane-dense bf16 buffer of shape (304, 128)."""
    w1, b1, w2, b2, w3, b3 = params
    p = jnp.zeros((P_ROWS, H), jnp.float32)
    p = p.at[W1_OFF:W1_OFF + F_IN, :].set(w1)
    p = p.at[B1_OFF, :].set(b1[0])
    p = p.at[W2_OFF:W2_OFF + H, :].set(w2)
    p = p.at[B2_OFF, :].set(b2[0])
    p = p.at[W3_OFF:W3_OFF + H, :OUT].set(w3)
    p = p.at[B3_OFF, :OUT].set(b3[0])
    return p.astype(jnp.bfloat16)


@functools.partial(jax.jit, static_argnames=("tm",))
def dqn_forward(x, packed_params, *, tm=1024):
    """x: (B, 4) float32 -> Q-values (B, 2) float32."""
    B = x.shape[0]
    tm = max(8, _round_up(tm, 8))                 # user tile forced to a multiple of 8
    b8 = _round_up(max(B, 1), 8)
    if b8 <= tm:
        # A single tile would give grid=(1,), leaving one v7x core idle.  Split the
        # batch over two steps once it is big enough that per-step overhead is noise.
        tm_eff = _round_up(-(-b8 // 2), 8) if b8 >= 2 * _MIN_SPLIT else b8
    else:
        tm_eff = tm
    bp = _round_up(b8, tm_eff)

    xp = jnp.pad(x.astype(jnp.bfloat16), ((0, bp - B), (0, 0)))   # fuses under jit

    cost = pl.CostEstimate(
        flops=2 * bp * (F_IN * H + H * H + H * H),
        transcendentals=0,
        bytes_accessed=bp * (F_IN * 2 + OUT * 4) + P_ROWS * H * 2,
    )

    out = pl.pallas_call(
        dqn_kernel,
        out_shape=jax.ShapeDtypeStruct((bp, OUT), jnp.float32),
        grid=(bp // tm_eff,),
        in_specs=[
            pl.BlockSpec((tm_eff, F_IN), lambda i: (i, 0)),
            # constant block index -> weights stay VMEM-resident across grid steps
            pl.BlockSpec((P_ROWS, H), lambda i: (0, 0)),
        ],
        out_specs=pl.BlockSpec((tm_eff, OUT), lambda i: (i, 0)),
        compiler_params=pltpu.CompilerParams(
            dimension_semantics=("parallel",),     # megacore batch split on v7x
        ),
        cost_estimate=cost,
    )(xp, packed_params)
    return out[:B]     # row-only slice; no-op / fused when B == bp


def init_params(key):
    """Deterministic init matching PyTorch nn.Linear default U[-1/sqrt(fan_in), 1/sqrt(fan_in)]."""
    dims = [(F_IN, H), (H, H), (H, OUT)]
    params = []
    for fin, fout in dims:
        kw, kb, key = jax.random.split(key, 3)
        bound = 1.0 / jnp.sqrt(jnp.float32(fin))
        w = jax.random.uniform(kw, (fin, fout), jnp.float32, -bound, bound)
        b = jax.random.uniform(kb, (1, fout), jnp.float32, -bound, bound)
        params.extend([w, b])
    return tuple(params)


def reference_forward(x, params):
    """Pure-JAX reference mirroring the kernel's bf16-weight / f32-accumulate math."""
    w1, b1, w2, b2, w3, b3 = params
    bf = lambda a: a.astype(jnp.bfloat16)
    f32 = lambda a: a.astype(jnp.bfloat16).astype(jnp.float32)
    h = jnp.maximum(jnp.dot(bf(x), bf(w1), preferred_element_type=jnp.float32) + f32(b1), 0.0)
    h = jnp.maximum(jnp.dot(bf(h), bf(w2), preferred_element_type=jnp.float32) + f32(b2), 0.0)
    return jnp.dot(bf(h), bf(w3), preferred_element_type=jnp.float32) + f32(b3)


if __name__ == "__main__":
    key = jax.random.PRNGKey(0)
    kx, kx2, kx3, kp = jax.random.split(key, 4)

    params = init_params(kp)
    packed = pack_params(params)

    # small CartPole-style batch (acting path, grid=(1,))
    x = jax.random.normal(kx, (8, F_IN), jnp.float32)
    q = jax.block_until_ready(dqn_forward(x, packed))
    assert q.shape == (8, OUT)
    assert jnp.allclose(q, reference_forward(x, params), atol=2e-3, rtol=2e-3), "mismatch (B=8)"

    # non-multiple batch with a small tile -> multi-step grid + row padding
    x2 = jax.random.normal(kx2, (33, F_IN), jnp.float32)
    q2 = jax.block_until_ready(dqn_forward(x2, packed, tm=16))
    assert q2.shape == (33, OUT)
    assert jnp.allclose(q2, reference_forward(x2, params), atol=2e-3, rtol=2e-3), "mismatch (B=33)"

    # larger batch exercising the 2-step megacore split (tm_eff = ceil(B/2) rounded to 8)
    x3 = jax.random.normal(kx3, (513, F_IN), jnp.float32)
    q3 = jax.block_until_ready(dqn_forward(x3, packed))
    assert q3.shape == (513, OUT)
    assert jnp.allclose(q3, reference_forward(x3, params), atol=2e-3, rtol=2e-3), "mismatch (B=513)"

    print("KERNEL_OK")
</pallas_src>

<mosaic_0001>
module attributes {stable_mosaic.version = 11 : i64} {
  func.func @dqn_kernel(%arg0: i32, %arg1: memref<8x4xbf16, #tpu.memory_space<vmem>>, %arg2: memref<304x128xbf16, #tpu.memory_space<vmem>>, %arg3: memref<8x2xf32, #tpu.memory_space<vmem>>) attributes {dimension_semantics = [#tpu.dimension_semantics<parallel>], iteration_bounds = array<i64: 1>, scalar_prefetch = 0 : i64, scratch_operands = 0 : i64, tpu.core_type = #tpu.core_type<tc>, window_params = [{transform_indices = @transform_0, window_bounds = array<i64: 8, 4>}, {pipeline_mode = #tpu.pipeline_mode<synchronous>, transform_indices = @transform_1, window_bounds = array<i64: 304, 128>}, {transform_indices = @transform_2, window_bounds = array<i64: 8, 2>}]} {
    %c0 = arith.constant 0 : index
    %c0_0 = arith.constant 0 : index
    %0 = vector.load %arg1[%c0, %c0_0] : memref<8x4xbf16, #tpu.memory_space<vmem>>, vector<8x4xbf16>
    %c0_1 = arith.constant 0 : index
    %c0_2 = arith.constant 0 : index
    %1 = vector.load %arg2[%c0_1, %c0_2] : memref<304x128xbf16, #tpu.memory_space<vmem>>, vector<4x128xbf16>
    %c8 = arith.constant 8 : index
    %c0_3 = arith.constant 0 : index
    %2 = vector.load %arg2[%c8, %c0_3] : memref<304x128xbf16, #tpu.memory_space<vmem>>, vector<1x128xbf16>
    %3 = arith.extf %2 : vector<1x128xbf16> to vector<1x128xf32>
    %cst = arith.constant dense<0.000000e+00> : vector<8x128xf32>
    %4 = tpu.matmul %0, %1, %cst {dimension_numbers = #tpu.dot_dimension_numbers<[1], [0], [0], [1], [0, 0, 1, 1], [], []>} : vector<8x4xbf16>, vector<4x128xbf16>, vector<8x128xf32> -> vector<8x128xf32>
    %5 = vector.broadcast %3 : vector<1x128xf32> to vector<8x128xf32>
    %6 = arith.addf %4, %5 : vector<8x128xf32>
    %cst_4 = arith.constant 0.000000e+00 : f32
    %7 = vector.broadcast %cst_4 : f32 to vector<8x128xf32>
    %8 = arith.maximumf %6, %7 : vector<8x128xf32>
    %c16 = arith.constant 16 : index
    %c0_5 = arith.constant 0 : index
    %9 = vector.load %arg2[%c16, %c0_5] : memref<304x128xbf16, #tpu.memory_space<vmem>>, vector<128x128xbf16>
    %c144 = arith.constant 144 : index
    %c0_6 = arith.constant 0 : index
    %10 = vector.load %arg2[%c144, %c0_6] : memref<304x128xbf16, #tpu.memory_space<vmem>>, vector<1x128xbf16>
    %11 = arith.extf %10 : vector<1x128xbf16> to vector<1x128xf32>
    %12 = arith.truncf %8 : vector<8x128xf32> to vector<8x128xbf16>
    %cst_7 = arith.constant dense<0.000000e+00> : vector<8x128xf32>
    %13 = tpu.matmul %12, %9, %cst_7 {dimension_numbers = #tpu.dot_dimension_numbers<[1], [0], [0], [1], [0, 0, 1, 1], [], []>} : vector<8x128xbf16>, vector<128x128xbf16>, vector<8x128xf32> -> vector<8x128xf32>
    %14 = vector.broadcast %11 : vector<1x128xf32> to vector<8x128xf32>
    %15 = arith.addf %13, %14 : vector<8x128xf32>
    %cst_8 = arith.constant 0.000000e+00 : f32
    %16 = vector.broadcast %cst_8 : f32 to vector<8x128xf32>
    %17 = arith.maximumf %15, %16 : vector<8x128xf32>
    %c160 = arith.constant 160 : index
    %c0_9 = arith.constant 0 : index
    %18 = vector.load %arg2[%c160, %c0_9] : memref<304x128xbf16, #tpu.memory_space<vmem>>, vector<128x128xbf16>
    %c288 = arith.constant 288 : index
    %c0_10 = arith.constant 0 : index
    %19 = vector.load %arg2[%c288, %c0_10] : memref<304x128xbf16, #tpu.memory_space<vmem>>, vector<1x128xbf16>
    %20 = arith.extf %19 : vector<1x128xbf16> to vector<1x128xf32>
    %21 = arith.truncf %17 : vector<8x128xf32> to vector<8x128xbf16>
    %cst_11 = arith.constant dense<0.000000e+00> : vector<8x128xf32>
    %22 = tpu.matmul %21, %18, %cst_11 {dimension_numbers = #tpu.dot_dimension_numbers<[1], [0], [0], [1], [0, 0, 1, 1], [], []>} : vector<8x128xbf16>, vector<128x128xbf16>, vector<8x128xf32> -> vector<8x128xf32>
    %23 = vector.extract_strided_slice %22 {offsets = [0, 0], sizes = [8, 2], strides = [1, 1]} : vector<8x128xf32> to vector<8x2xf32>
    %24 = vector.extract_strided_slice %20 {offsets = [0, 0], sizes = [1, 2], strides = [1, 1]} : vector<1x128xf32> to vector<1x2xf32>
    %25 = vector.broadcast %24 : vector<1x2xf32> to vector<8x2xf32>
    %26 = arith.addf %23, %25 : vector<8x2xf32>
    %c0_12 = arith.constant 0 : index
    %c0_13 = arith.constant 0 : index
    %27 = vector.load %arg3[%c0_12, %c0_13] : memref<8x2xf32, #tpu.memory_space<vmem>>, vector<8x2xf32>
    tpu.vector_store %arg3[%c0_12, %c0_13], %26 {strides = array<i32>} : memref<8x2xf32, #tpu.memory_space<vmem>>, vector<8x2xf32>,
    return
  }
  func.func @transform_0(%arg0: i32) -> (i32, i32) {
    %c0_i32 = arith.constant 0 : i32
    %c0_i32_0 = arith.constant 0 : i32
    return %arg0, %c0_i32 : i32, i32
  }
  func.func @transform_1(%arg0: i32) -> (i32, i32) {
    %c0_i32 = arith.constant 0 : i32
    %c0_i32_0 = arith.constant 0 : i32
    %c0_i32_1 = arith.constant 0 : i32
    return %c0_i32, %c0_i32_0 : i32, i32
  }
  func.func @transform_2(%arg0: i32) -> (i32, i32) {
    %c0_i32 = arith.constant 0 : i32
    %c0_i32_0 = arith.constant 0 : i32
    return %arg0, %c0_i32 : i32, i32
  }
}

</mosaic_0001>

<bundles_post_ra>
// kernel: dqn_forward.1
= control target key start
LH: loop header
LB: loop body
LE: loop exit
PB: predicated region body
PF: predicated region fallthrough
CT: control target
= control target key end

     0   :  { %7 = vsyncpa [#allocation3], 0  ;;  %s442_s9 = smov [#allocation2]   ;;  %s503_s0 = inlined_call_operand.vmem [shape: bf16[8,4], index: 0, kind: input, shape index: {}]   ;;  %s504_s1 = inlined_call_operand.hbm [shape: bf16[304,128], index: 1, kind: input, shape index: {}]   ;;  %s505_s2 = inlined_call_operand.vmem [shape: f32[8,2], index: 2, kind: output, shape index: {}]  }
   0x1   :  { %s15_s10 = sshll.u32 %s442_s9, 4  ;;  %s418_s13 = scalar_lea.hbm %s504_s1, 2432  ;;  %s16_s10 = int_to_ptr.vmem [resolvable:$true] %s15_s10 }
   0x2   :  { %p419_p0 = scmp.ne.s32.totalorder %s504_s1, %s418_s13  ;;  %p422_p1 = scmp.lt.u32.totalorder %s418_s13, %s504_s1 }
   0x4   :  { %p424_p2 = pnand %p422_p1, %p419_p0 }
   0x6   :  { %427 = shalt.err (!%p424_p2)
}
   0x7   :  { %s428_s18 = scalar_lea.vmem %s16_s10, 2432  ;;  %p433_p4 = scmp.lt.s32.totalorder %s16_s10, %s16_s10 }
   0x8   :  { %p429_p3 = scmp.ne.s32.totalorder %s16_s10, %s428_s18  ;;  %p434_p5 = scmp.lt.s32.totalorder %s428_s18, %s428_s18 }
   0xa   :  { %p435_p6 = por %p434_p5, %p433_p4 }
   0xc   :  { %p436_p7 = pnand %p435_p6, %p429_p3 }
   0xe   :  { %439 = shalt.err (!%p436_p7)
}
   0xf   :  { %s443_s19 = smov 64   ;;  %s444_s20 = smov 4  }
  0x10   :  { %21 = dma.hbm_to_vmem [thread:$0]  %s504_s1, 2432, %s16_s10, [#allocation3], %s443_s19, %s443_s19, %s444_s20  }
  0x11   :  { %440 = dma.done.wait [#allocation3], 2432  }
  0x12   :  { %441 = vsyncadd [#allocation3], 4294964864  ;;  %v445_v0 = vmov 0.0   ;;  %vm446_vm0 = vmmov 0   ;;  %vm38_vm1 = vcmask 1041408   ;;  %vm34_vm2 = vcmask 31744  }
  0x13   :  { %351 = vmatprep.subr.bf16.mxu0 %v445_v0  ;;  %353 = vmatprep.mubr.msk.bf16.mxu0 %vm446_vm0, %v445_v0  ;;  %v27_v1 = vld [vmem:[#allocation2] sm:$0x3]  ;;  %v402_v3 = vld [vmem:[#allocation2 + $0x8] sm:$0xff]   ;;  %v403_v5 = vld [vmem:[#allocation2 + $0x10] sm:$0xff]   ;;  %v30_v18 = vlaneseq  ;;  %vm307_vm3 = vcmask 15360  }
  0x14   :  { %357 = vmatprep.subr.bf16.mxu1 %v445_v0  ;;  %373 = vmatprep.mubr.msk.bf16.mxu1 %vm446_vm0, %v445_v0  ;;  %v40_v2 = vsel %vm38_vm1, %v27_v1, 0  ;;  %v26_v4 = vld [vmem:[%s503_s0] sm:$0xf]  ;;  %v404_v6 = vld [vmem:[#allocation2 + $0x18] sm:$0xff]   ;;  %v406_v8 = vld [vmem:[#allocation2 + $0x28] sm:$0xff]  }
  0x15   :  { %352 = vmatpush3.bf16.msra.mxu0 %v40_v2  ;;  %358 = vmatpush3.bf16.msra.mxu1 %v402_v3  ;;  %v405_v7 = vld [vmem:[#allocation2 + $0x20] sm:$0xff]   ;;  %v407_v9 = vld [vmem:[#allocation2 + $0x30] sm:$0xff]   ;;  %v408_v10 = vld [vmem:[#allocation2 + $0x38] sm:$0xff]   ;;  %v31_v19 = vshrl.u32 %v30_v18, 7 }
  0x16   :  { %377 = vmatprep.subr.bf16.mxu0 %v445_v0  ;;  %359 = vmatprep.subr.bf16.mxu1 %v445_v0  ;;  %v409_v11 = vld [vmem:[#allocation2 + $0x40] sm:$0xff]   ;;  %v410_v12 = vld [vmem:[#allocation2 + $0x50] sm:$0xff]   ;;  %v411_v13 = vld [vmem:[#allocation2 + $0x58] sm:$0xff]  }
  0x17   :  { %v412_v14 = vld [vmem:[#allocation2 + $0x60] sm:$0xff]   ;;  %v413_v15 = vld [vmem:[#allocation2 + $0x68] sm:$0xff]   ;;  %v414_v16 = vld [vmem:[#allocation2 + $0x70] sm:$0xff]   ;;  %v32_v22 = vsub.s32 0, %v31_v19 }
  0x18   :  { %354 = vmatmul.mubr.msk.bf16.vlgmr.msra.gmra.mrb[0].mxu0 %vm34_vm2, %v26_v4  ;;  %v415_v17 = vld [vmem:[#allocation2 + $0x78] sm:$0xff]   ;;  %v28_v20 = vld [vmem:[#allocation2 + $0x4] sm:$0x1]  ;;  %v417_v32 = vld [vmem:[#allocation2 + $0x88] sm:$0xff]  }
  0x19   :  { %393 = vmatprep.mubr.msk.bf16.mxu0 %vm446_vm0, %v445_v0  ;;  %360 = vmatpush3.bf16.msra.mxu1 %v403_v5  ;;  %v29_v21 = vunpack.c.l.bf16 %v28_v20  ;;  %v416_v31 = vld [vmem:[#allocation2 + $0x80] sm:$0xff]   ;;  %v99_v33 = vld [vmem:[#allocation2 + $0x48] sm:$0x1]  ;;  %v211_v43 = vld [vmem:[#allocation2 + $0x90] sm:$0x1] }
  0x1a   :  { %361 = vmatprep.subr.bf16.mxu1 %v445_v0  ;;  %378 = vmatpush3.bf16.msra.mxu0 %v410_v12  ;;  %v100_v34 = vunpack.c.l.bf16 %v99_v33  ;;  %v212_v44 = vunpack.c.l.bf16 %v211_v43 }
  0x1b   :  { %379 = vmatprep.subr.bf16.mxu0 %v445_v0  ;;  %v33_v23 = vrot.slane %v29_v21, %v32_v22 }
  0x1c   :  { %v105_v35 = vrot.slane %v100_v34, %v32_v22  ;;  %v305_v45 = vrot.slane %v212_v44, %v32_v22 }
  0x1d   :  { %362 = vmatpush3.bf16.msra.mxu1 %v404_v6 }
  0x1e   :  { %363 = vmatprep.subr.bf16.mxu1 %v445_v0  ;;  %380 = vmatpush3.bf16.msra.mxu0 %v411_v13 }
  0x1f   :  { %381 = vmatprep.subr.bf16.mxu0 %v445_v0 }
  0x21   :  { %364 = vmatpush3.bf16.msra.mxu1 %v405_v7 }
  0x22   :  { %365 = vmatprep.subr.bf16.mxu1 %v445_v0  ;;  %382 = vmatpush3.bf16.msra.mxu0 %v412_v14 }
  0x23   :  { %383 = vmatprep.subr.bf16.mxu0 %v445_v0 }
  0x25   :  { %366 = vmatpush3.bf16.msra.mxu1 %v406_v8 }
  0x26   :  { %367 = vmatprep.subr.bf16.mxu1 %v445_v0  ;;  %384 = vmatpush3.bf16.msra.mxu0 %v413_v15 }
  0x27   :  { %385 = vmatprep.subr.bf16.mxu0 %v445_v0 }
  0x29   :  { %368 = vmatpush3.bf16.msra.mxu1 %v407_v9 }
  0x2a   :  { %369 = vmatprep.subr.bf16.mxu1 %v445_v0  ;;  %386 = vmatpush3.bf16.msra.mxu0 %v414_v16 }
  0x2b   :  { %387 = vmatprep.subr.bf16.mxu0 %v445_v0 }
  0x2d   :  { %370 = vmatpush3.bf16.msra.mxu1 %v408_v10 }
  0x2e   :  { %371 = vmatprep.subr.bf16.mxu1 %v445_v0  ;;  %388 = vmatpush3.bf16.msra.mxu0 %v415_v17 }
  0x2f   :  { %389 = vmatprep.subr.bf16.mxu0 %v445_v0 }
  0x31   :  { %372 = vmatpush3.bf16.msra.mxu1 %v409_v11 }
  0x32   :  { %390 = vmatpush3.bf16.msra.mxu0 %v416_v31 }
  0x33   :  { %391 = vmatprep.subr.bf16.mxu0 %v445_v0 }
  0x36   :  { %392 = vmatpush3.bf16.msra.mxu0 %v417_v32 }
  0xeb   :  { %v76_v24 = vpop.f32.mrb[0].mxu0 }
  0xec   :  { %v77_v25 = vadd.f32 %v76_v24, %v33_v23  ;;  %v355_v26 = vpop.f32.mrb[1].mxu0 }
  0xed   :  { %v79_v27 = vpop.f32.mrb[2].mxu0 }
  0xee   :  { %v82_v28 = vmax.f32 %v77_v25, 0.0  ;;  %v356_v29 = vpop.f32.mrb[3].mxu0 }
  0xf0   :  { %v101_v30 = vpack.c.bf16 %v82_v28, %v82_v28 }
  0xf2   :  { %374 = vmatmul.mubr.bf16.vlgmr.msra.gmra.mrb[0].mxu1 %v101_v30 }
 0x1c5   :  { %v188_v36 = vpop.f32.mrb[0].mxu1 }
 0x1c6   :  { %v189_v37 = vadd.f32 %v188_v36, %v105_v35  ;;  %v375_v38 = vpop.f32.mrb[1].mxu1 }
 0x1c7   :  { %v191_v39 = vpop.f32.mrb[2].mxu1 }
 0x1c8   :  { %v194_v40 = vmax.f32 %v189_v37, 0.0  ;;  %v376_v41 = vpop.f32.mrb[3].mxu1 }
 0x1ca   :  { %v213_v42 = vpack.c.bf16 %v194_v40, %v194_v40 }
 0x1cc   :  { %394 = vmatmul.mubr.bf16.vlgmr.msra.gmra.mrb[4].mxu0 %v213_v42 }
 0x29f   :  { %v296_v46 = vpop.f32.mrb[4].mxu0 }
 0x2a0   :  { %v306_v47 = vadd.f32 %v305_v45, %v296_v46  ;;  %v395_v48 = vpop.f32.mrb[5].mxu0 }
 0x2a1   :  { %v299_v49 = vpop.f32.mrb[6].mxu0 }
 0x2a2   :  { %308 = vst.msk [vmem:[%s505_s2] sm:$0xff] %vm307_vm3, %v306_v47  ;;  %v396_v50 = vpop.f32.mrb[7].mxu0 }
 0x2a3   :  { %313 = vsyncpa [#allocation3], 1 }

</bundles_post_ra>
